<compile_context>
chip_gen: v7x
topology: tpu7x:2x2x1
jax: 0.10.0
libtpu: 0.0.40
codegen_flags: <defaults>
</compile_context>

<pallas_src>
import functools

import jax
import jax.numpy as jnp
from jax import lax
from jax.experimental import pallas as pl
from jax.experimental.pallas import tpu as pltpu


EPS = 1e-6
BETA_SHIFT = 0.0005

LANE = 128
SUBLANE = 8


def _round_up(x, m):
    return (x + m - 1) // m * m


def mag_kernel(fold_bias, *refs):
    """fold_bias is a static Python bool (bound via functools.partial)."""
    if fold_bias:
        (text_ref, vis_ref, ac_ref,
         w_text_ref, w_vis_ref, w_ac_ref, out_ref) = refs
    else:
        (text_ref, vis_ref, ac_ref,
         w_text_ref, w_vis_ref, w_ac_ref,
         b_gate_ref, b_proj_ref, out_ref) = refs

    f32 = jnp.float32
    Hp = out_ref.shape[-1]
    w_dtype = w_text_ref.dtype

    # Residual path keeps the original activation dtype; MXU inputs are cast
    # to the (bf16) weight dtype only at the dot.
    text = text_ref[...]
    t_in = text.astype(w_dtype)
    v_in = vis_ref[...].astype(w_dtype)
    a_in = ac_ref[...].astype(w_dtype)

    # Three fused (tm, Dp) @ (Dp, 2Hp) matmuls, f32 accumulation on the MXU.
    t2 = jnp.dot(t_in, w_text_ref[...], preferred_element_type=f32)  # [g_v_t | g_a_t]
    v2 = jnp.dot(v_in, w_vis_ref[...], preferred_element_type=f32)   # [g_v_v | h_v ]
    a2 = jnp.dot(a_in, w_ac_ref[...], preferred_element_type=f32)    # [g_a_a | h_a ]

    if fold_bias:
        # Biases arrive via the ones column folded into the padded K dim.
        gate_v = jnp.maximum(v2[:, :Hp] + t2[:, :Hp], 0.0)
        gate_a = jnp.maximum(a2[:, :Hp] + t2[:, Hp:], 0.0)
        hv = v2[:, Hp:]
        ha = a2[:, Hp:]
    else:
        b_gate = b_gate_ref[...].astype(f32)   # (1, 2Hp) = [b_hv | b_ha]
        b_proj = b_proj_ref[...].astype(f32)   # (1, 2Hp) = [b_v  | b_a ]
        gate_v = jnp.maximum(v2[:, :Hp] + t2[:, :Hp] + b_gate[:, :Hp], 0.0)
        gate_a = jnp.maximum(a2[:, :Hp] + t2[:, Hp:] + b_gate[:, Hp:], 0.0)
        hv = v2[:, Hp:] + b_proj[:, :Hp]
        ha = a2[:, Hp:] + b_proj[:, Hp:]

    h_m = gate_v * hv + gate_a * ha

    # f32 epilogue: per-token L2 norms, alpha clamp, residual add.
    text_f = text.astype(f32)
    em_sq = jnp.sum(text_f * text_f, axis=-1, keepdims=True)
    if fold_bias:
        # Remove the exact contribution of the folded ones column.
        em_sq = jnp.maximum(em_sq - 1.0, 0.0)
    em_norm = jnp.sqrt(em_sq)

    hm_sq = jnp.sum(h_m * h_m, axis=-1, keepdims=True)
    # hm_norm == 0 -> treat as 1 (matches the reference's where()).
    inv_hm = lax.rsqrt(jnp.where(hm_sq == 0.0, 1.0, hm_sq))
    alpha = jnp.minimum(em_norm * inv_hm * BETA_SHIFT, 1.0)

    out_ref[...] = (alpha * h_m + text_f).astype(out_ref.dtype)


def prepare_mag_params(params, n_dim, compute_dtype=jnp.bfloat16):
    """One-time weight prep: split, transpose, fuse, lane-pad, fold biases,
    and store at the MXU compute dtype (bf16 by default)."""
    D = n_dim
    H = params["b_v"].shape[-1]
    assert H == D, "MAG residual (alpha*h_m + text) requires nhidden == n_dim"
    Dp = _round_up(D, LANE)
    Hp = _round_up(H, LANE)
    fold_bias = Dp > D        # a spare padded K column exists for the ones trick

    def pad_w(w):             # (D, H) -> (Dp, Hp), zero pad
        return jnp.pad(w, ((0, Dp - D), (0, Hp - H)))

    def pad_b(b):             # (H,) -> (Hp,), zero pad
        return jnp.pad(b, (0, Hp - H))

    W_hv, W_ha = params["W_hv"], params["W_ha"]
    whv_v = pad_w(W_hv[:, :D].T)      # visual half of W_hv
    whv_t = pad_w(W_hv[:, D:].T)      # text   half of W_hv
    wha_a = pad_w(W_ha[:, :D].T)      # acoustic half of W_ha
    wha_t = pad_w(W_ha[:, D:].T)      # text     half of W_ha
    wv = pad_w(params["W_v"].T)
    wa = pad_w(params["W_a"].T)

    b_hv, b_ha = pad_b(params["b_hv"]), pad_b(params["b_ha"])
    b_v, b_a = pad_b(params["b_v"]), pad_b(params["b_a"])

    w_text = jnp.concatenate([whv_t, wha_t], axis=1)   # (Dp, 2Hp)
    w_vis = jnp.concatenate([whv_v, wv], axis=1)       # (Dp, 2Hp)
    w_ac = jnp.concatenate([wha_a, wa], axis=1)        # (Dp, 2Hp)

    prepared = {}
    if fold_bias:
        # Row D of each weight multiplies the ones column of the activations.
        zeros = jnp.zeros((Hp,), w_text.dtype)
        w_text = w_text.at[D].set(jnp.concatenate([b_hv, b_ha]))
        w_vis = w_vis.at[D].set(jnp.concatenate([zeros, b_v]))
        w_ac = w_ac.at[D].set(jnp.concatenate([zeros, b_a]))
    else:
        prepared["b_gate"] = jnp.concatenate([b_hv, b_ha]).reshape(1, 2 * Hp).astype(jnp.float32)
        prepared["b_proj"] = jnp.concatenate([b_v, b_a]).reshape(1, 2 * Hp).astype(jnp.float32)

    prepared["w_text"] = w_text.astype(compute_dtype)
    prepared["w_vis"] = w_vis.astype(compute_dtype)
    prepared["w_ac"] = w_ac.astype(compute_dtype)
    return prepared


def mag_forward(text_embedding, visual, acoustic, prepared, *,
                vmem_budget_bytes=40 << 20, tm_cap=1024):
    """MAG forward. Inputs: (B, L, D); output: (B, L, D) (nhidden == n_dim)."""
    B, L, D = text_embedding.shape
    N = B * L
    H = D

    w_text = prepared["w_text"]
    Dp, two_Hp = w_text.shape
    Hp = two_Hp // 2
    assert Dp == Hp, "MAG residual add requires nhidden == n_dim (Dp == Hp)"
    fold_bias = "b_gate" not in prepared        # static pytree-structure check
    assert fold_bias == (Dp > D)

    act_dtype = text_embedding.dtype
    act_itemsize = jnp.dtype(act_dtype).itemsize
    w_itemsize = jnp.dtype(w_text.dtype).itemsize

    # ---- token tile from a VMEM budget (v7x 64 MiB aware) ----
    # weights: single-buffered; activation streams + output: double-buffered.
    weight_bytes = 3 * Dp * two_Hp * w_itemsize
    per_row = 2 * 3 * Dp * act_itemsize + 2 * Hp * act_itemsize
    avail = max(vmem_budget_bytes - weight_bytes, per_row * SUBLANE)
    tm = (avail // per_row) // SUBLANE * SUBLANE
    tm = max(SUBLANE, min(tm, tm_cap))
    tm = min(tm, _round_up(N, SUBLANE))
    # Keep >= 2 grid steps when possible so the "parallel" token axis can
    # actually shard across v7x's two TensorCores.
    if tm >= N and N > SUBLANE:
        tm = _round_up((N + 1) // 2, SUBLANE)
    Np = _round_up(N, tm)
    grid = (Np // tm,)

    def pad_act(x):
        x2 = x.reshape(N, D)
        if Np != N or Dp != D:                  # skip the HBM pass when a no-op
            x2 = jnp.pad(x2, ((0, Np - N), (0, Dp - D)))
        if fold_bias:
            x2 = x2.at[:, D].set(jnp.ones((), x2.dtype))   # bias ones column
        return x2

    text2 = pad_act(text_embedding)
    vis2 = pad_act(visual)
    ac2 = pad_act(acoustic)

    act_spec = pl.BlockSpec((tm, Dp), lambda i: (i, 0))             # streamed
    # Constant index_map -> single-buffer the resident weights/biases.
    w_spec = pl.BlockSpec((Dp, two_Hp), lambda i: (0, 0),
                          pipeline_mode=pl.Buffered(1))
    out_spec = pl.BlockSpec((tm, Hp), lambda i: (i, 0))

    operands = [text2, vis2, ac2,
                prepared["w_text"], prepared["w_vis"], prepared["w_ac"]]
    in_specs = [act_spec, act_spec, act_spec, w_spec, w_spec, w_spec]
    bias_bytes = 0
    if not fold_bias:
        b_spec = pl.BlockSpec((1, two_Hp), lambda i: (0, 0),
                              pipeline_mode=pl.Buffered(1))
        operands += [prepared["b_gate"], prepared["b_proj"]]
        in_specs += [b_spec, b_spec]
        bias_bytes = 2 * two_Hp * 4

    vmem_need = weight_bytes + per_row * tm + bias_bytes
    vmem_limit = int(min(max(2 * vmem_need, 32 << 20), 56 << 20))
    if vmem_limit < vmem_need + (4 << 20):
        vmem_limit = int(vmem_need + (4 << 20))

    cost = pl.CostEstimate(
        flops=int(2 * 3 * Np * Dp * two_Hp),          # three (Np,Dp)x(Dp,2Hp) dots
        transcendentals=int(2 * Np),                  # sqrt + rsqrt per token
        bytes_accessed=int(3 * Np * Dp * act_itemsize
                           + Np * Hp * act_itemsize
                           + weight_bytes + bias_bytes),
    )

    out = pl.pallas_call(
        functools.partial(mag_kernel, fold_bias),
        out_shape=jax.ShapeDtypeStruct((Np, Hp), act_dtype),
        grid=grid,
        in_specs=in_specs,
        out_specs=out_spec,
        compiler_params=pltpu.CompilerParams(
            dimension_semantics=("parallel",),
            vmem_limit_bytes=vmem_limit),
        cost_estimate=cost,
    )(*operands)

    if Np == N and Hp == H:
        return out.reshape(B, L, H)                   # no slice pass needed
    return out[:N, :H].reshape(B, L, H)


def init_mag_params(key, n_dim, nhidden):
    """Deterministic parameter init matching nn.Linear shapes."""
    ks = jax.random.split(key, 8)
    scale_2d = 1.0 / jnp.sqrt(2.0 * n_dim)
    scale_1d = 1.0 / jnp.sqrt(1.0 * n_dim)
    return {
        "W_hv": jax.random.uniform(ks[0], (nhidden, 2 * n_dim), jnp.float32,
                                   -scale_2d, scale_2d),
        "b_hv": jax.random.uniform(ks[1], (nhidden,), jnp.float32,
                                   -scale_2d, scale_2d),
        "W_ha": jax.random.uniform(ks[2], (nhidden, 2 * n_dim), jnp.float32,
                                   -scale_2d, scale_2d),
        "b_ha": jax.random.uniform(ks[3], (nhidden,), jnp.float32,
                                   -scale_2d, scale_2d),
        "W_v": jax.random.uniform(ks[4], (nhidden, n_dim), jnp.float32,
                                  -scale_1d, scale_1d),
        "b_v": jax.random.uniform(ks[5], (nhidden,), jnp.float32,
                                  -scale_1d, scale_1d),
        "W_a": jax.random.uniform(ks[6], (nhidden, n_dim), jnp.float32,
                                  -scale_1d, scale_1d),
        "b_a": jax.random.uniform(ks[7], (nhidden,), jnp.float32,
                                  -scale_1d, scale_1d),
    }


def mag_reference(text_embedding, visual, acoustic, params):
    """Pure-JAX reference mirroring the PyTorch forward."""
    lin = lambda x, W, b: x @ W.T + b
    cat_vt = jnp.concatenate([visual, text_embedding], axis=-1)
    cat_at = jnp.concatenate([acoustic, text_embedding], axis=-1)
    weight_v = jax.nn.relu(lin(cat_vt, params["W_hv"], params["b_hv"]))
    weight_a = jax.nn.relu(lin(cat_at, params["W_ha"], params["b_ha"]))
    h_m = weight_v * lin(visual, params["W_v"], params["b_v"]) \
        + weight_a * lin(acoustic, params["W_a"], params["b_a"])
    em_norm = jnp.linalg.norm(text_embedding, axis=-1)
    hm_norm = jnp.linalg.norm(h_m, axis=-1)
    hm_norm = jnp.where(hm_norm == 0, jnp.ones_like(hm_norm), hm_norm)
    thresh = em_norm / (hm_norm + EPS) * BETA_SHIFT
    alpha = jnp.minimum(thresh, jnp.ones_like(thresh))[..., None]
    return alpha * h_m + text_embedding


if __name__ == "__main__":
    B, L, D = 2, 8, 32          # n_dim == nhidden == 32
    H = D

    key = jax.random.PRNGKey(0)
    k_par, k_t, k_v, k_a = jax.random.split(key, 4)

    params = init_mag_params(k_par, n_dim=D, nhidden=H)
    text = jax.random.normal(k_t, (B, L, D), jnp.float32)
    visual = jax.random.normal(k_v, (B, L, D), jnp.float32)
    acoustic = jax.random.normal(k_a, (B, L, D), jnp.float32)

    # One-time weight prep (split / transpose / fuse / pad / fold bias / bf16).
    prepared = prepare_mag_params(params, n_dim=D, compute_dtype=jnp.bfloat16)

    mag_jit = jax.jit(mag_forward)
    out = mag_jit(text, visual, acoustic, prepared)
    out = jax.block_until_ready(out)

    ref = mag_reference(text, visual, acoustic, params)
    assert out.shape == (B, L, H)
    # bf16 MXU dots -> slightly looser tolerance than the pure-f32 reference;
    # alpha*h_m is scaled by beta_shift, so the absolute error stays tiny.
    assert jnp.allclose(out, ref, atol=2e-3, rtol=2e-3), \
        f"max abs err {jnp.max(jnp.abs(out - ref))}"

    print("KERNEL_OK")
</pallas_src>

<mosaic_0001>
module attributes {stable_mosaic.version = 11 : i64} {
  func.func @mag_kernel(%arg0: i32, %arg1: memref<8x128xf32, #tpu.memory_space<vmem>>, %arg2: memref<8x128xf32, #tpu.memory_space<vmem>>, %arg3: memref<8x128xf32, #tpu.memory_space<vmem>>, %arg4: memref<128x256xbf16, #tpu.memory_space<vmem>>, %arg5: memref<128x256xbf16, #tpu.memory_space<vmem>>, %arg6: memref<128x256xbf16, #tpu.memory_space<vmem>>, %arg7: memref<8x128xf32, #tpu.memory_space<vmem>>) attributes {dimension_semantics = [#tpu.dimension_semantics<parallel>], iteration_bounds = array<i64: 2>, scalar_prefetch = 0 : i64, scratch_operands = 0 : i64, tpu.core_type = #tpu.core_type<tc>, window_params = [{transform_indices = @transform_0, window_bounds = array<i64: 8, 128>}, {transform_indices = @transform_1, window_bounds = array<i64: 8, 128>}, {transform_indices = @transform_2, window_bounds = array<i64: 8, 128>}, {pipeline_mode = #tpu.pipeline_mode<synchronous>, transform_indices = @transform_3, window_bounds = array<i64: 128, 256>}, {pipeline_mode = #tpu.pipeline_mode<synchronous>, transform_indices = @transform_4, window_bounds = array<i64: 128, 256>}, {pipeline_mode = #tpu.pipeline_mode<synchronous>, transform_indices = @transform_5, window_bounds = array<i64: 128, 256>}, {transform_indices = @transform_6, window_bounds = array<i64: 8, 128>}]} {
    %c0 = arith.constant 0 : index
    %c0_0 = arith.constant 0 : index
    %0 = vector.load %arg1[%c0, %c0_0] : memref<8x128xf32, #tpu.memory_space<vmem>>, vector<8x128xf32>
    %1 = arith.truncf %0 : vector<8x128xf32> to vector<8x128xbf16>
    %c0_1 = arith.constant 0 : index
    %c0_2 = arith.constant 0 : index
    %2 = vector.load %arg2[%c0_1, %c0_2] : memref<8x128xf32, #tpu.memory_space<vmem>>, vector<8x128xf32>
    %3 = arith.truncf %2 : vector<8x128xf32> to vector<8x128xbf16>
    %c0_3 = arith.constant 0 : index
    %c0_4 = arith.constant 0 : index
    %4 = vector.load %arg3[%c0_3, %c0_4] : memref<8x128xf32, #tpu.memory_space<vmem>>, vector<8x128xf32>
    %5 = arith.truncf %4 : vector<8x128xf32> to vector<8x128xbf16>
    %c0_5 = arith.constant 0 : index
    %c0_6 = arith.constant 0 : index
    %6 = vector.load %arg4[%c0_5, %c0_6] : memref<128x256xbf16, #tpu.memory_space<vmem>>, vector<128x256xbf16>
    %cst = arith.constant dense<0.000000e+00> : vector<8x256xf32>
    %7 = tpu.matmul %1, %6, %cst {dimension_numbers = #tpu.dot_dimension_numbers<[1], [0], [0], [1], [0, 0, 1, 1], [], []>} : vector<8x128xbf16>, vector<128x256xbf16>, vector<8x256xf32> -> vector<8x256xf32>
    %c0_7 = arith.constant 0 : index
    %c0_8 = arith.constant 0 : index
    %8 = vector.load %arg5[%c0_7, %c0_8] : memref<128x256xbf16, #tpu.memory_space<vmem>>, vector<128x256xbf16>
    %cst_9 = arith.constant dense<0.000000e+00> : vector<8x256xf32>
    %9 = tpu.matmul %3, %8, %cst_9 {dimension_numbers = #tpu.dot_dimension_numbers<[1], [0], [0], [1], [0, 0, 1, 1], [], []>} : vector<8x128xbf16>, vector<128x256xbf16>, vector<8x256xf32> -> vector<8x256xf32>
    %c0_10 = arith.constant 0 : index
    %c0_11 = arith.constant 0 : index
    %10 = vector.load %arg6[%c0_10, %c0_11] : memref<128x256xbf16, #tpu.memory_space<vmem>>, vector<128x256xbf16>
    %cst_12 = arith.constant dense<0.000000e+00> : vector<8x256xf32>
    %11 = tpu.matmul %5, %10, %cst_12 {dimension_numbers = #tpu.dot_dimension_numbers<[1], [0], [0], [1], [0, 0, 1, 1], [], []>} : vector<8x128xbf16>, vector<128x256xbf16>, vector<8x256xf32> -> vector<8x256xf32>
    %12 = vector.extract_strided_slice %9 {offsets = [0, 0], sizes = [8, 128], strides = [1, 1]} : vector<8x256xf32> to vector<8x128xf32>
    %13 = vector.extract_strided_slice %7 {offsets = [0, 0], sizes = [8, 128], strides = [1, 1]} : vector<8x256xf32> to vector<8x128xf32>
    %14 = arith.addf %12, %13 : vector<8x128xf32>
    %cst_13 = arith.constant 0.000000e+00 : f32
    %15 = vector.broadcast %cst_13 : f32 to vector<8x128xf32>
    %16 = arith.maximumf %14, %15 : vector<8x128xf32>
    %17 = vector.extract_strided_slice %11 {offsets = [0, 0], sizes = [8, 128], strides = [1, 1]} : vector<8x256xf32> to vector<8x128xf32>
    %18 = vector.extract_strided_slice %7 {offsets = [0, 128], sizes = [8, 128], strides = [1, 1]} : vector<8x256xf32> to vector<8x128xf32>
    %19 = arith.addf %17, %18 : vector<8x128xf32>
    %cst_14 = arith.constant 0.000000e+00 : f32
    %20 = vector.broadcast %cst_14 : f32 to vector<8x128xf32>
    %21 = arith.maximumf %19, %20 : vector<8x128xf32>
    %22 = vector.extract_strided_slice %9 {offsets = [0, 128], sizes = [8, 128], strides = [1, 1]} : vector<8x256xf32> to vector<8x128xf32>
    %23 = vector.extract_strided_slice %11 {offsets = [0, 128], sizes = [8, 128], strides = [1, 1]} : vector<8x256xf32> to vector<8x128xf32>
    %24 = arith.mulf %16, %22 : vector<8x128xf32>
    %25 = arith.mulf %21, %23 : vector<8x128xf32>
    %26 = arith.addf %24, %25 : vector<8x128xf32>
    %27 = arith.mulf %0, %0 : vector<8x128xf32>
    %cst_15 = arith.constant dense<0.000000e+00> : vector<8xf32>
    %28 = vector.multi_reduction <add>, %27, %cst_15 [1] : vector<8x128xf32> to vector<8xf32>
    %29 = vector.shape_cast %28 : vector<8xf32> to vector<8x1xf32>
    %cst_16 = arith.constant 1.000000e+00 : f32
    %30 = vector.broadcast %cst_16 : f32 to vector<8x1xf32>
    %31 = arith.subf %29, %30 : vector<8x1xf32>
    %cst_17 = arith.constant 0.000000e+00 : f32
    %32 = vector.broadcast %cst_17 : f32 to vector<8x1xf32>
    %33 = arith.maximumf %31, %32 : vector<8x1xf32>
    %34 = math.sqrt %33 : vector<8x1xf32>
    %35 = arith.mulf %26, %26 : vector<8x128xf32>
    %cst_18 = arith.constant dense<0.000000e+00> : vector<8xf32>
    %36 = vector.multi_reduction <add>, %35, %cst_18 [1] : vector<8x128xf32> to vector<8xf32>
    %37 = vector.shape_cast %36 : vector<8xf32> to vector<8x1xf32>
    %cst_19 = arith.constant 0.000000e+00 : f32
    %38 = vector.broadcast %cst_19 : f32 to vector<8x1xf32>
    %39 = arith.cmpf oeq, %37, %38 : vector<8x1xf32>
    %cst_20 = arith.constant 1.000000e+00 : f32
    %40 = vector.broadcast %cst_20 : f32 to vector<8x1xf32>
    %41 = arith.select %39, %40, %37 : vector<8x1xi1>, vector<8x1xf32>
    %42 = math.rsqrt %41 : vector<8x1xf32>
    %43 = arith.mulf %34, %42 : vector<8x1xf32>
    %cst_21 = arith.constant 5.000000e-04 : f32
    %44 = vector.broadcast %cst_21 : f32 to vector<8x1xf32>
    %45 = arith.mulf %43, %44 : vector<8x1xf32>
    %cst_22 = arith.constant 1.000000e+00 : f32
    %46 = vector.broadcast %cst_22 : f32 to vector<8x1xf32>
    %47 = arith.minimumf %45, %46 : vector<8x1xf32>
    %48 = vector.broadcast %47 : vector<8x1xf32> to vector<8x128xf32>
    %49 = arith.mulf %48, %26 : vector<8x128xf32>
    %50 = arith.addf %49, %0 : vector<8x128xf32>
    %c0_23 = arith.constant 0 : index
    %c0_24 = arith.constant 0 : index
    %51 = vector.load %arg7[%c0_23, %c0_24] : memref<8x128xf32, #tpu.memory_space<vmem>>, vector<8x128xf32>
    tpu.vector_store %arg7[%c0_23, %c0_24], %50 {strides = array<i32>} : memref<8x128xf32, #tpu.memory_space<vmem>>, vector<8x128xf32>,
    return
  }
  func.func @transform_0(%arg0: i32) -> (i32, i32) {
    %c0_i32 = arith.constant 0 : i32
    %c0_i32_0 = arith.constant 0 : i32
    return %arg0, %c0_i32 : i32, i32
  }
  func.func @transform_1(%arg0: i32) -> (i32, i32) {
    %c0_i32 = arith.constant 0 : i32
    %c0_i32_0 = arith.constant 0 : i32
    return %arg0, %c0_i32 : i32, i32
  }
  func.func @transform_2(%arg0: i32) -> (i32, i32) {
    %c0_i32 = arith.constant 0 : i32
    %c0_i32_0 = arith.constant 0 : i32
    return %arg0, %c0_i32 : i32, i32
  }
  func.func @transform_3(%arg0: i32) -> (i32, i32) {
    %c0_i32 = arith.constant 0 : i32
    %c0_i32_0 = arith.constant 0 : i32
    %c0_i32_1 = arith.constant 0 : i32
    return %c0_i32, %c0_i32_0 : i32, i32
  }
  func.func @transform_4(%arg0: i32) -> (i32, i32) {
    %c0_i32 = arith.constant 0 : i32
    %c0_i32_0 = arith.constant 0 : i32
    %c0_i32_1 = arith.constant 0 : i32
    return %c0_i32, %c0_i32_0 : i32, i32
  }
  func.func @transform_5(%arg0: i32) -> (i32, i32) {
    %c0_i32 = arith.constant 0 : i32
    %c0_i32_0 = arith.constant 0 : i32
    %c0_i32_1 = arith.constant 0 : i32
    return %c0_i32, %c0_i32_0 : i32, i32
  }
  func.func @transform_6(%arg0: i32) -> (i32, i32) {
    %c0_i32 = arith.constant 0 : i32
    %c0_i32_0 = arith.constant 0 : i32
    return %arg0, %c0_i32 : i32, i32
  }
}

</mosaic_0001>

<bundles_post_ra>
// kernel: mag_forward.1
= control target key start
LH: loop header
LB: loop body
LE: loop exit
PB: predicated region body
PF: predicated region fallthrough
CT: control target
= control target key end

     0   :  { %11 = vsyncpa [#allocation3], 0  ;;  %s1073_s21 = smov 0   ;;  %s1247_s0 = inlined_call_operand.vmem [shape: f32[16,128], index: 0, kind: input, shape index: {}]   ;;  %s1248_s1 = inlined_call_operand.vmem [shape: f32[16,128], index: 1, kind: input, shape index: {}]   ;;  %s1249_s2 = inlined_call_operand.vmem [shape: f32[16,128], index: 2, kind: input, shape index: {}]   ;;  %s1250_s3 = inlined_call_operand.vmem [shape: bf16[128,256], index: 3, kind: input, shape index: {}]   ;;  %s1251_s4 = inlined_call_operand.vmem [shape: bf16[128,256], index: 4, kind: input, shape index: {}]   ;;  %s1252_s5 = inlined_call_operand.hbm [shape: bf16[128,256], index: 5, kind: input, shape index: {}]   ;;  %s1253_s6 = inlined_call_operand.vmem [shape: f32[16,128], index: 6, kind: output, shape index: {}]  }
   0x1 LB: > { %s1079_s22 = sadd.s32 4294967295, %s1032_s21   ;;  %p836_p0 = scmp.ge.s32.totalorder %s1032_s21, 1  ;;  %s1032_s21 = sphi %s1073_s21, %s17_s21  }
   0x2   : > { %p189_p1 = scmp.lt.s32.totalorder %s1032_s21, 3  ;;  %s1034_s23 = smov [#allocation2]  }
   0x3   : > { %s207_s24 = sshll.u32 %s1034_s23, 4  ;;  %p1254_p3 = scmp.eq.s32.totalorder %s1079_s22, 0  ;;  %s208_s24 = int_to_ptr.vmem [resolvable:$true] %s207_s24 }
   0x4   : > { %p1083_p2 = pnand %p836_p0, %p189_p1  ;;  %s994_s29 = scalar_lea.hbm %s1252_s5, 2048 }
   0x5   : > { %p995_p6 = scmp.ne.s32.totalorder %s1252_s5, %s994_s29  ;;  %p1001_p10 = scmp.lt.u32.totalorder %s994_s29, %s1252_s5 }
   0x6   : > { %s1256_s25 = scalar_select %p1083_p2, 1, 0 }
   0x7   : > { %p900_p4 = pneg %p1083_p2 }
   0x9   : > { %p1092_p5 = pnand %p1254_p3, %p900_p4 }
   0xb   : > { %p996_p7 = pneg %p1092_p5 }
   0xd   : > { %p997_p8 = pnand %p996_p7, %p995_p6 }
   0xf   : > { %p998_p9 = pneg %p997_p8 }
  0x11   : > { %p1003_p11 = pnand %p1001_p10, %p998_p9 }
  0x13   : > { %1006 = shalt.err (!%p1003_p11)
}
  0x14   : > { %s1007_s10 = scalar_lea.vmem %s208_s24, 2048  ;;  %p1015_p1 = scmp.lt.s32.totalorder %s208_s24, %s208_s24 }
  0x15   : > { %p1008_p12 = scmp.ne.s32.totalorder %s208_s24, %s1007_s10  ;;  %p1016_p4 = scmp.lt.s32.totalorder %s1007_s10, %s1007_s10 }
  0x17   : > { %p1010_p13 = pnand %p1008_p12, %p996_p7  ;;  %p1017_p3 = por %p1016_p4, %p1015_p1 }
  0x19   : > { %p1011_p0 = pneg %p1010_p13 }
  0x1b   : > { %p1018_p2 = pnand %p1017_p3, %p1011_p0 }
  0x1d   : > { %1021 = shalt.err (!%p1018_p2)
}
  0x1e   : > { %s1035_s11 = smov 128   ;;  %s1036_s12 = smov 8  }
  0x1f   : > { %903 = dma.hbm_to_vmem [thread:$0]  (!%p1092_p5), %s1252_s5, 2048, %s208_s24, [#allocation3], %s1035_s11, %s1035_s11, %s1036_s12  }
  0x20   : > { %p1258_p6 = scmp.ne.s32.totalorder %s1256_s25, 0 }
  0x21   : > { %p1259_p8 = scmp.eq.s32.totalorder (!%p1258_p6), %s1079_s22, 0 }
  0x22   : > { %244 = sbr.rel (%p1258_p6) target bundleno = 496 (0x1f0), region = 44 }
  0x29   : > { %1027 = dma.done.wait (%p1259_p8), [#allocation3], 2048   ;;  %p1260_p7 = pmov %p1259_p8 }
  0x2a   : > { %v1037_v0 = vmov 0   ;;  %v918_v1 = vld [vmem:[%s1250_s3 + $0x4] ss:$8 sps:$4 sm:$0xff]   ;;  %v920_v2 = vld [vmem:[%s1250_s3] ss:$8 sps:$4 sm:$0xff]   ;;  %p280_p2 = scmp.lt.s32.totalorder %s1079_s22, 1 }
  0x2b   : > { %1029 = vsyncadd (%p1260_p7), [#allocation3], 4294965248  ;;  %431 = vmatprep.mubr.bf16.mxu0 %v1037_v0  ;;  %568 = vmatprep.mubr.bf16.mxu1 %v1037_v0  ;;  %v921_v3 = vld [vmem:[%s1251_s4 + $0x4] ss:$8 sps:$4 sm:$0xff]   ;;  %v923_v4 = vld [vmem:[%s1251_s4] ss:$8 sps:$4 sm:$0xff]  }
  0x2c   : > { %399 = vmatprep.subr.bf16.mxu0 %v918_v1  ;;  %v924_v5 = vld [vmem:[%s1250_s3 + $0x14] ss:$8 sps:$4 sm:$0xff]   ;;  %v926_v6 = vld [vmem:[%s1250_s3 + $0x10] ss:$8 sps:$4 sm:$0xff]   ;;  %536 = vmatprep.subr.bf16.mxu1 %v921_v3  ;;  %v930_v9 = vld [vmem:[%s1250_s3 + $0x24] ss:$8 sps:$4 sm:$0xff]  }
  0x2d   : > { %400 = vmatpush1.bf16.msra.mxu0 %v920_v2  ;;  %v927_v7 = vld [vmem:[%s1251_s4 + $0x14] ss:$8 sps:$4 sm:$0xff]   ;;  %537 = vmatpush1.bf16.msra.mxu1 %v923_v4  ;;  %v929_v8 = vld [vmem:[%s1251_s4 + $0x10] ss:$8 sps:$4 sm:$0xff]   ;;  %v932_v10 = vld [vmem:[%s1250_s3 + $0x20] ss:$8 sps:$4 sm:$0xff]  }
  0x2e   : > { %401 = vmatprep.subr.bf16.mxu0 %v924_v5  ;;  %538 = vmatprep.subr.bf16.mxu1 %v927_v7  ;;  %v933_v11 = vld [vmem:[%s1251_s4 + $0x24] ss:$8 sps:$4 sm:$0xff]   ;;  %v936_v12 = vld [vmem:[%s1250_s3 + $0x34] ss:$8 sps:$4 sm:$0xff]   ;;  %v935_v13 = vld [vmem:[%s1251_s4 + $0x20] ss:$8 sps:$4 sm:$0xff]  }
  0x2f   : > { %v939_v14 = vld [vmem:[%s1251_s4 + $0x34] ss:$8 sps:$4 sm:$0xff]   ;;  %v938_v15 = vld [vmem:[%s1250_s3 + $0x30] ss:$8 sps:$4 sm:$0xff]   ;;  %v942_v16 = vld [vmem:[%s1250_s3 + $0x44] ss:$8 sps:$4 sm:$0xff]  }
  0x30   : > { %v941_v17 = vld [vmem:[%s1251_s4 + $0x30] ss:$8 sps:$4 sm:$0xff]   ;;  %v945_v18 = vld [vmem:[%s1251_s4 + $0x44] ss:$8 sps:$4 sm:$0xff]   ;;  %v944_v19 = vld [vmem:[%s1250_s3 + $0x40] ss:$8 sps:$4 sm:$0xff]  }
  0x31   : > { %402 = vmatpush1.bf16.msra.mxu0 %v926_v6  ;;  %539 = vmatpush1.bf16.msra.mxu1 %v929_v8  ;;  %v948_v20 = vld [vmem:[%s1250_s3 + $0x54] ss:$8 sps:$4 sm:$0xff]   ;;  %v947_v21 = vld [vmem:[%s1251_s4 + $0x40] ss:$8 sps:$4 sm:$0xff]   ;;  %s1262_s22 = smov (!%p280_p2, %s1079_s22), 1 }
  0x32   : > { %403 = vmatprep.subr.bf16.mxu0 %v930_v9  ;;  %540 = vmatprep.subr.bf16.mxu1 %v933_v11  ;;  %v951_v22 = vld [vmem:[%s1251_s4 + $0x54] ss:$8 sps:$4 sm:$0xff]   ;;  %v950_v23 = vld [vmem:[%s1250_s3 + $0x50] ss:$8 sps:$4 sm:$0xff]   ;;  %v954_v24 = vld [vmem:[%s1250_s3 + $0x64] ss:$8 sps:$4 sm:$0xff]  }
  0x33   : > { %v953_v25 = vld [vmem:[%s1251_s4 + $0x50] ss:$8 sps:$4 sm:$0xff]   ;;  %s1197_s23 = sshll.u32 %s1262_s22, 3  ;;  %v957_v26 = vld [vmem:[%s1251_s4 + $0x64] ss:$8 sps:$4 sm:$0xff]  }
  0x34   : > { %v956_v27 = vld [vmem:[%s1250_s3 + $0x60] ss:$8 sps:$4 sm:$0xff]   ;;  %v960_v28 = vld [vmem:[%s1250_s3 + $0x74] ss:$8 sps:$4 sm:$0xff]   ;;  %s283_s7 = scalar_lea.vmem %s1247_s0, %s1197_s23  ;;  %v962_v30 = vld [vmem:[%s1250_s3 + $0x70] ss:$8 sps:$4 sm:$0xff]   ;;  %s287_s16 = scalar_lea.vmem %s1248_s1, %s1197_s23 }
  0x35   : > { %404 = vmatpush1.bf16.msra.mxu0 %v932_v10  ;;  %541 = vmatpush1.bf16.msra.mxu1 %v935_v13  ;;  %v959_v29 = vld [vmem:[%s1251_s4 + $0x60] ss:$8 sps:$4 sm:$0xff]   ;;  %v963_v31 = vld [vmem:[%s1251_s4 + $0x74] ss:$8 sps:$4 sm:$0xff]   ;;  %v968_v33 = vld [vmem:[#allocation2 + $0x4] ss:$8 sps:$4 sm:$0xff]   ;;  %s291_s24 = scalar_lea.vmem %s1249_s2, %s1197_s23  ;;  %s295_s27 = scalar_lea.vmem %s1253_s6, %s1197_s23 }
  0x36   : > { %405 = vmatprep.subr.bf16.mxu0 %v936_v12  ;;  %542 = vmatprep.subr.bf16.mxu1 %v939_v14  ;;  %v1225_v32 = vld [vmem:[%s283_s7] sm:$0xff]  ;;  %v965_v34 = vld [vmem:[%s1251_s4 + $0x70] ss:$8 sps:$4 sm:$0xff]   ;;  %v971_v39 = vld [vmem:[#allocation2 + $0x14] ss:$8 sps:$4 sm:$0xff]  }
  0x37   : > { %v299_v35 = vld [vmem:[%s287_s16] sm:$0xff]  ;;  %v298_v36 = vpack.c.bf16 %v1225_v32, %v1225_v32  ;;  %v969_v40 = vld [vmem:[#allocation2 + $0x10] ss:$8 sps:$4 sm:$0xff]   ;;  %v977_v43 = vld [vmem:[#allocation2 + $0x34] ss:$8 sps:$4 sm:$0xff]   ;;  %v721_v55 = vmul.f32 %v1225_v32, %v1225_v32 }
  0x38   : > { %v966_v37 = vld [vmem:[#allocation2] ss:$8 sps:$4 sm:$0xff]   ;;  %v300_v38 = vpack.c.bf16 %v299_v35, %v299_v35  ;;  %v974_v41 = vld [vmem:[#allocation2 + $0x24] ss:$8 sps:$4 sm:$0xff]   ;;  %v975_v44 = vld [vmem:[#allocation2 + $0x30] ss:$8 sps:$4 sm:$0xff]  }
  0x39   : > { %406 = vmatpush1.bf16.msra.mxu0 %v938_v15  ;;  %543 = vmatpush1.bf16.msra.mxu1 %v941_v17  ;;  %v972_v42 = vld [vmem:[#allocation2 + $0x20] ss:$8 sps:$4 sm:$0xff]   ;;  %v980_v45 = vld [vmem:[#allocation2 + $0x44] ss:$8 sps:$4 sm:$0xff]   ;;  %v983_v47 = vld [vmem:[#allocation2 + $0x54] ss:$8 sps:$4 sm:$0xff]  }
  0x3a   : > { %407 = vmatprep.subr.bf16.mxu0 %v942_v16  ;;  %544 = vmatprep.subr.bf16.mxu1 %v945_v18  ;;  %v978_v46 = vld [vmem:[#allocation2 + $0x40] ss:$8 sps:$4 sm:$0xff]   ;;  %v981_v48 = vld [vmem:[#allocation2 + $0x50] ss:$8 sps:$4 sm:$0xff]   ;;  %v986_v49 = vld [vmem:[#allocation2 + $0x64] ss:$8 sps:$4 sm:$0xff]  }
  0x3b   : > { %v984_v50 = vld [vmem:[#allocation2 + $0x60] ss:$8 sps:$4 sm:$0xff]   ;;  %v989_v51 = vld [vmem:[#allocation2 + $0x74] ss:$8 sps:$4 sm:$0xff]   ;;  %v987_v52 = vld [vmem:[#allocation2 + $0x70] ss:$8 sps:$4 sm:$0xff]   ;;  %722 = vadd.xlane.f32.xlu0 %v721_v55 }
  0x3c   : > { %v301_v53 = vld [vmem:[%s291_s24] sm:$0xff] }
  0x3d   : > { %408 = vmatpush1.bf16.msra.mxu0 %v944_v19  ;;  %545 = vmatpush1.bf16.msra.mxu1 %v947_v21  ;;  %v302_v54 = vpack.c.bf16 %v301_v53, %v301_v53 }
  0x3e   : > { %409 = vmatprep.subr.bf16.mxu0 %v948_v20  ;;  %546 = vmatprep.subr.bf16.mxu1 %v951_v22 }
  0x41   : > { %410 = vmatpush1.bf16.msra.mxu0 %v950_v23  ;;  %547 = vmatpush1.bf16.msra.mxu1 %v953_v25 }
  0x42   : > { %411 = vmatprep.subr.bf16.mxu0 %v954_v24  ;;  %548 = vmatprep.subr.bf16.mxu1 %v957_v26 }
  0x45   : > { %412 = vmatpush1.bf16.msra.mxu0 %v956_v27  ;;  %549 = vmatpush1.bf16.msra.mxu1 %v959_v29 }
  0x46   : > { %413 = vmatprep.subr.bf16.mxu0 %v960_v28  ;;  %550 = vmatprep.subr.bf16.mxu1 %v963_v31 }
  0x49   : > { %414 = vmatpush1.bf16.msra.mxu0 %v962_v30  ;;  %551 = vmatpush1.bf16.msra.mxu1 %v965_v34 }
  0x4a   : > { %673 = vmatprep.subr.bf16.mxu0 %v968_v33 }
  0x4c   : > { %432 = vmatmul.mubr.bf16.vlgmr.msra.gmra.mrb[0].mxu0 %v298_v36  ;;  %569 = vmatmul.mubr.bf16.vlgmr.msra.gmra.mrb[0].mxu1 %v300_v38 }
  0x4d   : > { %674 = vmatpush1.bf16.msra.mxu0 %v966_v37  ;;  %705 = vmatprep.mubr.bf16.mxu0 %v1037_v0 }
  0x4e   : > { %675 = vmatprep.subr.bf16.mxu0 %v971_v39 }
  0x51   : > { %676 = vmatpush1.bf16.msra.mxu0 %v969_v40 }
  0x52   : > { %677 = vmatprep.subr.bf16.mxu0 %v974_v41 }
  0x55   : > { %678 = vmatpush1.bf16.msra.mxu0 %v972_v42 }
  0x56   : > { %679 = vmatprep.subr.bf16.mxu0 %v977_v43 }
  0x59   : > { %680 = vmatpush1.bf16.msra.mxu0 %v975_v44 }
  0x5a   : > { %681 = vmatprep.subr.bf16.mxu0 %v980_v45 }
  0x5d   : > { %682 = vmatpush1.bf16.msra.mxu0 %v978_v46 }
  0x5e   : > { %683 = vmatprep.subr.bf16.mxu0 %v983_v47 }
  0x61   : > { %684 = vmatpush1.bf16.msra.mxu0 %v981_v48 }
  0x62   : > { %685 = vmatprep.subr.bf16.mxu0 %v986_v49 }
  0x65   : > { %686 = vmatpush1.bf16.msra.mxu0 %v984_v50 }
  0x66   : > { %687 = vmatprep.subr.bf16.mxu0 %v989_v51 }
  0x69   : > { %688 = vmatpush1.bf16.msra.mxu0 %v987_v52 }
  0x6c   : > { %706 = vmatmul.mubr.bf16.vlgmr.msra.gmra.mrb[4].mxu0 %v302_v54 }
  0xc8   : > { %v723_v12 = vpop.xlane.xlu0 %722 }
  0xc9   : > { %v893_v13 = vadd.f32 -1.0, %v723_v12 }
  0xcb   : > { %v725_v14 = vmax.f32 %v893_v13, 0.0 }
  0xcd   : > { %990 = vrsqrt.f32 %v725_v14  ;;  %vm728_vm1 = vcmp.eq.f32.partialorder %v725_v14, inf  ;;  %v731_v19 = vand.u32 2147483648, %v725_v14  ;;  %vm730_vm2 = vcmp.eq.f32.partialorder %v725_v14, 0.0 }
  0xd7   : > { %v991_v17 = vpop.eup %990 }
  0xd8   : > { %v727_v18 = vmul.f32 %v991_v17, %v725_v14 }
  0xda   : > { %v729_v20 = vsel %vm728_vm1, %v725_v14, %v727_v18 }
  0xdb   : > { %v732_v22 = vsel %vm730_vm2, %v731_v19, %v729_v20 }
 0x11f   : > { %v433_v56 = vpop.f32.mrb[0].mxu0  ;;  %v570_v58 = vpop.f32.mrb[0].mxu1 }
 0x120   : > { %v435_v57 = vpop.f32.mrb[1].mxu0  ;;  %v714_v60 = vadd.f32 %v570_v58, %v433_v56  ;;  %v572_v62 = vpop.f32.mrb[1].mxu1 }
 0x121   : > { %v437_v59 = vpop.f32.mrb[2].mxu0  ;;  %v574_v63 = vpop.f32.mrb[2].mxu1 }
 0x122   : > { %v438_v61 = vpop.f32.mrb[3].mxu0  ;;  %v715_v0 = vmax.f32 %v714_v60, 0.0  ;;  %v575_v1 = vpop.f32.mrb[3].mxu1 }
 0x124   : > { %v718_v2 = vmul.f32 %v715_v0, %v572_v62 }
 0x13f   : > { %v707_v3 = vpop.f32.mrb[4].mxu0 }
 0x140   : > { %v716_v4 = vadd.f32 %v707_v3, %v435_v57  ;;  %v709_v5 = vpop.f32.mrb[5].mxu0 }
 0x141   : > { %v711_v6 = vpop.f32.mrb[6].mxu0 }
 0x142   : > { %v717_v7 = vmax.f32 %v716_v4, 0.0  ;;  %v712_v8 = vpop.f32.mrb[7].mxu0 }
 0x144   : > { %v719_v9 = vmul.f32 %v717_v7, %v709_v5 }
 0x146   : > { %v720_v10 = vadd.f32 %v719_v9, %v718_v2 }
 0x148   : > { %v733_v11 = vmul.f32 %v720_v10, %v720_v10 }
 0x14a   : > { %734 = vadd.xlane.f32.xlu0 %v733_v11 }
 0x1d7   : > { %v735_v15 = vpop.xlane.xlu0 %734 }
 0x1d8   : > { %vm736_vm0 = vcmp.eq.f32.partialorder %v735_v15, 0.0 }
 0x1d9   : > { %v737_v16 = vsel %vm736_vm0, 1.0, %v735_v15 }
 0x1da   : > { %992 = vrsqrt.f32 %v737_v16 }
 0x1e4   : > { %v993_v21 = vpop.eup %992 }
 0x1e5   : > { %v739_v23 = vmul.f32 %v993_v21, %v732_v22 }
 0x1e7   : > { %v740_v24 = vmul.f32 0.0005, %v739_v23 }
 0x1e9   : > { %v741_v25 = vmin.f32 %v740_v24, 1.0 }
 0x1eb   : > { %v742_v26 = vmul.f32 %v741_v25, %v720_v10 }
 0x1ed   : > { %v743_v27 = vadd.f32 %v742_v26, %v1225_v32 }
 0x1ef   : > { %744 = vst [vmem:[%s295_s27] sm:$0xff] %v743_v27 }
 0x1f0 PF: > { %s17_s21 = sadd.s32 1, %s1032_s21  }
 0x1f1   : > { %p14_p3 = scmp.ge.s32.totalorder %s17_s21, 4  }
 0x1f3   :  { %16 = sbr.rel (!%p14_p3) target bundleno = 1 (0x1), region = 85 }
 0x1fa   :  { %764 = vsyncpa [#allocation3], 1 }
 0x1fb   :  { %766 = vsyncpa [#allocation3 + $0x1], 1 }

</bundles_post_ra>
